<compile_context>
chip_gen: v7x
topology: tpu7x:2x2x1
jax: 0.10.0
libtpu: 0.0.40
codegen_flags: <defaults>
</compile_context>

<pallas_src>
import math
import functools

import jax
import jax.numpy as jnp
from jax.experimental import pallas as pl
from jax.experimental.pallas import tpu as pltpu

_NEG_INF = -1e30
_SINGLE_BUF = None  # lazily-probed: does this JAX support pl.Buffered(1)?


# --------------------------------------------------------------------------
# helpers
# --------------------------------------------------------------------------
def _rmsnorm(x, w, eps):
    var = jnp.mean(x * x, axis=-1, keepdims=True)
    return x * jax.lax.rsqrt(var + eps) * w


def _single_buffer_supported():
    """Probe (once) whether pipeline_mode=pl.Buffered(1) compiles here."""
    global _SINGLE_BUF
    if _SINGLE_BUF is not None:
        return _SINGLE_BUF
    if not hasattr(pl, "Buffered"):
        _SINGLE_BUF = False
        return _SINGLE_BUF
    try:
        def _k(x_ref, o_ref):
            o_ref[...] = x_ref[...] * 2.0

        spec = pl.BlockSpec((8, 128), lambda i: (0, 0),
                            pipeline_mode=pl.Buffered(1))
        out = pl.pallas_call(
            _k,
            out_shape=jax.ShapeDtypeStruct((8, 128), jnp.float32),
            grid=(1,),
            in_specs=[spec],
            out_specs=pl.BlockSpec((8, 128), lambda i: (0, 0)),
        )(jnp.zeros((8, 128), jnp.float32))
        jax.block_until_ready(out)
        _SINGLE_BUF = True
    except Exception:
        _SINGLE_BUF = False
    return _SINGLE_BUF


def _resident_spec(shape):
    """BlockSpec for a grid-invariant (weight/bias) operand.

    Single-buffered when supported: the block index never changes, so a second
    buffer only doubles the VMEM footprint.
    """
    index_map = lambda *args: (0,) * len(shape)
    if _single_buffer_supported():
        try:
            return pl.BlockSpec(shape, index_map, pipeline_mode=pl.Buffered(1))
        except TypeError:
            pass
    return pl.BlockSpec(shape, index_map)


def _vmem_limit_bytes():
    """Scoped-VMEM ceiling: chip capacity minus headroom (v7x-safe)."""
    cap = None
    try:
        cap = int(pltpu.get_tpu_info().vmem_capacity_bytes)
    except Exception:
        cap = None
    if not cap or cap <= 0:
        cap = 64 * 2 ** 20            # conservative default (v7x per-core)
    cap = min(cap, 128 * 2 ** 20)
    return max(32 * 2 ** 20, cap - 8 * 2 ** 20)


def _divisor_tile(n, prefs):
    for p in prefs:
        if n >= p and n % p == 0:
            return p
    return n


# --------------------------------------------------------------------------
# pass 1: RMSNorm1 + Q/K/V projection  (KV-cache precompute, head-split bf16)
# --------------------------------------------------------------------------
def _qkv_kernel(x_ref, ln1_ref, wq_ref, bq_ref, wkv_ref, bkv_ref,
                q_ref, k_ref, v_ref, *, num_head, eps):
    ts = x_ref.shape[1]
    C = x_ref.shape[2]
    hd = C // num_head
    scale = 1.0 / math.sqrt(hd)

    x = x_ref[0].astype(jnp.float32)
    xn = _rmsnorm(x, ln1_ref[0], eps).astype(jnp.bfloat16)

    q = jnp.dot(xn, wq_ref[...], preferred_element_type=jnp.float32) + bq_ref[0]
    kv = jnp.dot(xn, wkv_ref[...], preferred_element_type=jnp.float32) + bkv_ref[0]

    def heads(y):                                # (ts, C) -> (H, ts, hd)
        return jnp.transpose(y.reshape(ts, num_head, hd), (1, 0, 2))

    # fold the 1/sqrt(hd) softmax scale into q once (not per KV block)
    q_ref[0] = heads(q * scale).astype(q_ref.dtype)
    k_ref[0] = heads(kv[:, :C]).astype(k_ref.dtype)
    v_ref[0] = heads(kv[:, C:]).astype(v_ref.dtype)


# --------------------------------------------------------------------------
# pass 2: flash attention (online softmax over KV blocks) + out-proj + residual
# --------------------------------------------------------------------------
def _attn_kernel(q_ref, k_ref, v_ref, xres_ref, wproj_ref, bproj_ref,
                 o_ref, m_scr, l_scr, acc_scr, *, tq, tk):
    H = q_ref.shape[1]
    hd = q_ref.shape[3]
    C = H * hd

    qi = pl.program_id(1)
    ki = pl.program_id(2)
    nk = pl.num_programs(2)

    @pl.when(ki == 0)
    def _init():
        m_scr[...] = jnp.full(m_scr.shape, -jnp.inf, jnp.float32)
        l_scr[...] = jnp.zeros(l_scr.shape, jnp.float32)
        acc_scr[...] = jnp.zeros(acc_scr.shape, jnp.float32)

    q_start = qi * tq
    kv_start = ki * tk

    # skip fully-masked (future) KV blocks entirely (their DMA is also
    # suppressed by the clamped index_map in the wrapper)
    @pl.when(kv_start < q_start + tq)
    def _attend():
        k = k_ref[0]                              # (H, TK, hd) bf16
        v = v_ref[0]                              # (H, TK, hd) bf16
        s = jnp.einsum("hqd,hkd->hqk", q_ref[0], k,
                       preferred_element_type=jnp.float32)   # (H, TQ, TK)

        def online_update(s_blk):
            m_prev = m_scr[...]
            m_new = jnp.maximum(m_prev, jnp.max(s_blk, axis=-1, keepdims=True))
            alpha = jnp.exp(m_prev - m_new)
            p = jnp.exp(s_blk - m_new)
            l_scr[...] = alpha * l_scr[...] + jnp.sum(p, axis=-1, keepdims=True)
            acc_scr[...] = alpha * acc_scr[...] + jnp.einsum(
                "hqk,hkd->hqd", p.astype(jnp.bfloat16), v,
                preferred_element_type=jnp.float32)
            m_scr[...] = m_new

        # interior blocks (every key visible to every query row) skip the mask
        interior = kv_start + tk <= q_start + 1

        @pl.when(interior)
        def _full_block():
            online_update(s)

        @pl.when(jnp.logical_not(interior))
        def _diag_block():
            row = jax.lax.broadcasted_iota(jnp.int32, (tq, tk), 0) + q_start
            col = jax.lax.broadcasted_iota(jnp.int32, (tq, tk), 1) + kv_start
            bias = jnp.where(col <= row, 0.0, _NEG_INF).astype(jnp.float32)
            online_update(s + bias[None, :, :])

    @pl.when(ki == nk - 1)
    def _finalize():
        att = acc_scr[...] * pl.reciprocal(l_scr[...], approx=True)  # (H,TQ,hd)
        y = jnp.transpose(att, (1, 0, 2)).reshape(tq, C)             # (TQ, C)
        y = jnp.dot(y.astype(jnp.bfloat16), wproj_ref[...],
                    preferred_element_type=jnp.float32) + bproj_ref[0]
        o_ref[0] = (xres_ref[0].astype(jnp.float32) + y).astype(o_ref.dtype)


# --------------------------------------------------------------------------
# pass 3: RMSNorm2 + MLP (F-tiled, streamed weights) + residual
# --------------------------------------------------------------------------
def _mlp_kernel(x_ref, ln2_ref, wfc_ref, bfc_ref, wfc2_ref, bfc2_ref,
                o_ref, xn_scr, acc_scr, *, eps):
    f = pl.program_id(2)
    nf = pl.num_programs(2)

    @pl.when(f == 0)
    def _init():
        x = x_ref[0].astype(jnp.float32)
        xn_scr[...] = _rmsnorm(x, ln2_ref[0], eps).astype(xn_scr.dtype)
        acc_scr[...] = jnp.zeros(acc_scr.shape, jnp.float32)

    h = jnp.dot(xn_scr[...], wfc_ref[...],
                preferred_element_type=jnp.float32) + bfc_ref[0]
    h = jax.nn.gelu(h, approximate=False)                    # nn.GELU() (exact)
    acc_scr[...] += jnp.dot(h.astype(jnp.bfloat16), wfc2_ref[...],
                            preferred_element_type=jnp.float32)

    @pl.when(f == nf - 1)
    def _finalize():
        o_ref[0] = (x_ref[0].astype(jnp.float32) + acc_scr[...]
                    + bfc2_ref[0]).astype(o_ref.dtype)


# --------------------------------------------------------------------------
# wrapper
# --------------------------------------------------------------------------
def transformer_decoder_layer(x, params, *, num_head, eps=1e-6,
                              seq_tile=256, ffn_tile=None):
    """x: (B, T, C) float32.  Three fused Pallas passes (QKV / flash / MLP)."""
    B, T, C = x.shape
    F = params["w_fc"].shape[0]
    H = num_head
    assert C % H == 0
    hd = C // H

    # -- sequence tiling (pad instead of full-materialization fallback) --
    TS = T if T <= seq_tile else seq_tile
    Tp = ((T + TS - 1) // TS) * TS
    NT = Tp // TS
    TQ = TK = TS
    NQ = NK = NT

    if ffn_tile is not None and F % ffn_tile == 0:
        TF = ffn_tile
    else:
        TF = _divisor_tile(F, (1024, 512, 256, 128))
    NF = F // TF

    f32 = jnp.float32
    bf16 = jnp.bfloat16

    # -- one-time weight prep in XLA: split qkv, transpose to (in,out), cast --
    w_qkv = params["w_qkv"]                    # (3C, C) PyTorch (out, in)
    b_qkv = params["b_qkv"]                    # (1, 3C)
    w_q_t = jnp.asarray(w_qkv[:C].T, bf16)     # (C, C)
    w_kv_t = jnp.asarray(w_qkv[C:].T, bf16)    # (C, 2C)
    w_pj_t = jnp.asarray(params["w_proj"].T, bf16)     # (C, C)
    w_fc_t = jnp.asarray(params["w_fc"].T, bf16)       # (C, F)
    w_f2_t = jnp.asarray(params["w_fc_proj"].T, bf16)  # (F, C)
    b_q = jnp.asarray(b_qkv[:, :C], f32)
    b_kv = jnp.asarray(b_qkv[:, C:], f32)
    b_pj = jnp.asarray(params["b_proj"], f32)
    b_fc = jnp.asarray(params["b_fc"], f32)
    b_f2 = jnp.asarray(params["b_fc_proj"], f32)
    ln1 = jnp.asarray(params["ln1_w"], f32)
    ln2 = jnp.asarray(params["ln2_w"], f32)

    xp = x if Tp == T else jnp.pad(x, ((0, 0), (0, Tp - T), (0, 0)))
    vmem_limit = _vmem_limit_bytes()

    # ---------------- pass 1: Q/K/V cache precompute ----------------
    q_c, k_c, v_c = pl.pallas_call(
        functools.partial(_qkv_kernel, num_head=H, eps=eps),
        out_shape=(
            jax.ShapeDtypeStruct((B, H, Tp, hd), bf16),
            jax.ShapeDtypeStruct((B, H, Tp, hd), bf16),
            jax.ShapeDtypeStruct((B, H, Tp, hd), bf16),
        ),
        grid_spec=pltpu.PrefetchScalarGridSpec(
            num_scalar_prefetch=0,
            grid=(B, NT),
            in_specs=[
                pl.BlockSpec((1, TS, C), lambda b, t: (b, t, 0)),
                _resident_spec((1, C)),          # ln1 weight
                _resident_spec((C, C)),          # w_q^T
                _resident_spec((1, C)),          # b_q
                _resident_spec((C, 2 * C)),      # w_kv^T
                _resident_spec((1, 2 * C)),      # b_kv
            ],
            out_specs=[
                pl.BlockSpec((1, H, TS, hd), lambda b, t: (b, 0, t, 0)),
                pl.BlockSpec((1, H, TS, hd), lambda b, t: (b, 0, t, 0)),
                pl.BlockSpec((1, H, TS, hd), lambda b, t: (b, 0, t, 0)),
            ],
        ),
        compiler_params=pltpu.CompilerParams(
            dimension_semantics=("parallel", "parallel"),
            vmem_limit_bytes=vmem_limit),
    )(xp, ln1, w_q_t, b_q, w_kv_t, b_kv)

    # ---------------- pass 2: flash attention + out-proj + residual ----------
    def kv_map(b, qi, ki):
        # clamp future (fully-masked) KV blocks to the last visible block so
        # Pallas skips their prefetch DMA entirely
        last = ((qi + 1) * TQ - 1) // TK
        return (b, 0, jnp.minimum(ki, last), 0)

    x1 = pl.pallas_call(
        functools.partial(_attn_kernel, tq=TQ, tk=TK),
        out_shape=jax.ShapeDtypeStruct((B, Tp, C), f32),
        grid_spec=pltpu.PrefetchScalarGridSpec(
            num_scalar_prefetch=0,
            grid=(B, NQ, NK),
            in_specs=[
                pl.BlockSpec((1, H, TQ, hd), lambda b, qi, ki: (b, 0, qi, 0)),
                pl.BlockSpec((1, H, TK, hd), kv_map),
                pl.BlockSpec((1, H, TK, hd), kv_map),
                pl.BlockSpec((1, TQ, C), lambda b, qi, ki: (b, qi, 0)),  # residual
                _resident_spec((C, C)),          # w_proj^T
                _resident_spec((1, C)),          # b_proj
            ],
            out_specs=pl.BlockSpec((1, TQ, C), lambda b, qi, ki: (b, qi, 0)),
            scratch_shapes=[
                pltpu.VMEM((H, TQ, 1), jnp.float32),    # running max
                pltpu.VMEM((H, TQ, 1), jnp.float32),    # running denom
                pltpu.VMEM((H, TQ, hd), jnp.float32),   # output accumulator
            ],
        ),
        compiler_params=pltpu.CompilerParams(
            dimension_semantics=("parallel", "parallel", "arbitrary"),
            vmem_limit_bytes=vmem_limit),
    )(q_c, k_c, v_c, xp, w_pj_t, b_pj)

    # ---------------- pass 3: RMSNorm2 + MLP (F-tiled) + residual ------------
    out = pl.pallas_call(
        functools.partial(_mlp_kernel, eps=eps),
        out_shape=jax.ShapeDtypeStruct((B, Tp, C), x.dtype),
        grid_spec=pltpu.PrefetchScalarGridSpec(
            num_scalar_prefetch=0,
            grid=(B, NT, NF),
            in_specs=[
                pl.BlockSpec((1, TS, C), lambda b, t, f: (b, t, 0)),
                _resident_spec((1, C)),                              # ln2 weight
                pl.BlockSpec((C, TF), lambda b, t, f: (0, f)),       # w_fc^T tile
                pl.BlockSpec((1, TF), lambda b, t, f: (0, f)),       # b_fc tile
                pl.BlockSpec((TF, C), lambda b, t, f: (f, 0)),       # w_fc_proj^T tile
                _resident_spec((1, C)),                              # b_fc_proj
            ],
            out_specs=pl.BlockSpec((1, TS, C), lambda b, t, f: (b, t, 0)),
            scratch_shapes=[
                pltpu.VMEM((TS, C), jnp.bfloat16),   # cached RMSNorm2(x)
                pltpu.VMEM((TS, C), jnp.float32),    # MLP accumulator
            ],
        ),
        compiler_params=pltpu.CompilerParams(
            dimension_semantics=("parallel", "parallel", "arbitrary"),
            vmem_limit_bytes=vmem_limit),
    )(x1, ln2, w_fc_t, b_fc, w_f2_t, b_f2)

    return out if Tp == T else out[:, :T, :]


# --------------------------------------------------------------------------
# pure-JAX reference (for verification)
# --------------------------------------------------------------------------
def _ref_forward(x, params, num_head, eps=1e-6):
    def rmsnorm(x, w):
        var = jnp.mean(x * x, axis=-1, keepdims=True)
        return x * jax.lax.rsqrt(var + eps) * w[0]

    B, T, C = x.shape
    hd = C // num_head

    xn = rmsnorm(x, params["ln1_w"])
    qkv = jnp.einsum("btc,oc->bto", xn, params["w_qkv"]) + params["b_qkv"][0]
    q, k, v = jnp.split(qkv, 3, axis=-1)
    q = q.reshape(B, T, num_head, hd).transpose(0, 2, 1, 3)
    k = k.reshape(B, T, num_head, hd).transpose(0, 2, 1, 3)
    v = v.reshape(B, T, num_head, hd).transpose(0, 2, 1, 3)
    s = jnp.einsum("bhqd,bhkd->bhqk", q, k) / math.sqrt(hd)
    mask = jnp.tril(jnp.ones((T, T), bool))
    s = jnp.where(mask, s, -jnp.inf)
    p = jax.nn.softmax(s, axis=-1)
    y = jnp.einsum("bhqk,bhkd->bhqd", p, v).transpose(0, 2, 1, 3).reshape(B, T, C)
    y = jnp.einsum("btc,oc->bto", y, params["w_proj"]) + params["b_proj"][0]
    x = x + y

    xn = rmsnorm(x, params["ln2_w"])
    h = jnp.einsum("btc,fc->btf", xn, params["w_fc"]) + params["b_fc"][0]
    h = jax.nn.gelu(h, approximate=False)
    h = jnp.einsum("btf,cf->btc", h, params["w_fc_proj"]) + params["b_fc_proj"][0]
    return x + h


if __name__ == "__main__":
    B = 2
    d_model, num_head = 32, 4

    key = jax.random.PRNGKey(0)
    ks = jax.random.split(key, 24)
    init = lambda k, shape: (0.02 * jax.random.normal(k, shape)).astype(jnp.float32)

    def make_params(dim_ff, koff):
        return {
            "ln1_w":     jnp.ones((1, d_model), jnp.float32),
            "w_qkv":     init(ks[koff + 0], (3 * d_model, d_model)),
            "b_qkv":     init(ks[koff + 1], (1, 3 * d_model)),
            "w_proj":    init(ks[koff + 2], (d_model, d_model)),
            "b_proj":    init(ks[koff + 3], (1, d_model)),
            "ln2_w":     jnp.ones((1, d_model), jnp.float32),
            "w_fc":      init(ks[koff + 4], (dim_ff, d_model)),
            "b_fc":      init(ks[koff + 5], (1, dim_ff)),
            "w_fc_proj": init(ks[koff + 6], (d_model, dim_ff)),
            "b_fc_proj": init(ks[koff + 7], (1, d_model)),
        }

    # test 1: single-block path (TQ = TK = T, single F block)
    params1 = make_params(64, 0)
    xa = jax.random.normal(ks[16], (B, 8, d_model), dtype=jnp.float32)
    out1 = jax.block_until_ready(
        transformer_decoder_layer(xa, params1, num_head=num_head))
    ref1 = _ref_forward(xa, params1, num_head)
    assert out1.shape == xa.shape
    assert jnp.allclose(out1, ref1, rtol=2e-3, atol=2e-3), "mismatch (single block)"

    # test 2: padded T + multi-block flash (causal skip / clamped DMA) + F-tiled MLP
    params2 = make_params(256, 8)
    xb = jax.random.normal(ks[17], (B, 12, d_model), dtype=jnp.float32)
    out2 = jax.block_until_ready(
        transformer_decoder_layer(xb, params2, num_head=num_head,
                                  seq_tile=8, ffn_tile=128))
    ref2 = _ref_forward(xb, params2, num_head)
    assert jnp.allclose(out2, ref2, rtol=2e-3, atol=2e-3), "mismatch (padded/tiled)"

    # test 3: multi-block flash without padding
    xc = jax.random.normal(ks[18], (B, 16, d_model), dtype=jnp.float32)
    out3 = jax.block_until_ready(
        transformer_decoder_layer(xc, params1, num_head=num_head, seq_tile=8))
    ref3 = _ref_forward(xc, params1, num_head)
    assert jnp.allclose(out3, ref3, rtol=2e-3, atol=2e-3), "mismatch (multi-block)"

    print("KERNEL_OK")
</pallas_src>

<mosaic_0001>
module attributes {stable_mosaic.version = 11 : i64} {
  func.func @_k(%arg0: i32, %arg1: memref<8x128xf32, #tpu.memory_space<vmem>>, %arg2: memref<8x128xf32, #tpu.memory_space<vmem>>) attributes {dimension_semantics = [#tpu.dimension_semantics<arbitrary>], iteration_bounds = array<i64: 1>, scalar_prefetch = 0 : i64, scratch_operands = 0 : i64, tpu.core_type = #tpu.core_type<tc>, window_params = [{pipeline_mode = #tpu.pipeline_mode<synchronous>, transform_indices = @transform_0, window_bounds = array<i64: 8, 128>}, {pipeline_mode = #tpu.pipeline_mode<synchronous>, transform_indices = @transform_1, window_bounds = array<i64: 8, 128>}]} {
    %c0 = arith.constant 0 : index
    %c0_0 = arith.constant 0 : index
    %0 = vector.load %arg1[%c0, %c0_0] : memref<8x128xf32, #tpu.memory_space<vmem>>, vector<8x128xf32>
    %cst = arith.constant 2.000000e+00 : f32
    %1 = vector.broadcast %cst : f32 to vector<8x128xf32>
    %2 = arith.mulf %0, %1 : vector<8x128xf32>
    %c0_1 = arith.constant 0 : index
    %c0_2 = arith.constant 0 : index
    %3 = vector.load %arg2[%c0_1, %c0_2] : memref<8x128xf32, #tpu.memory_space<vmem>>, vector<8x128xf32>
    tpu.vector_store %arg2[%c0_1, %c0_2], %2 {strides = array<i32>} : memref<8x128xf32, #tpu.memory_space<vmem>>, vector<8x128xf32>,
    return
  }
  func.func @transform_0(%arg0: i32) -> (i32, i32) {
    %c0_i32 = arith.constant 0 : i32
    %c0_i32_0 = arith.constant 0 : i32
    %c0_i32_1 = arith.constant 0 : i32
    return %c0_i32, %c0_i32_0 : i32, i32
  }
  func.func @transform_1(%arg0: i32) -> (i32, i32) {
    %c0_i32 = arith.constant 0 : i32
    %c0_i32_0 = arith.constant 0 : i32
    %c0_i32_1 = arith.constant 0 : i32
    return %c0_i32, %c0_i32_0 : i32, i32
  }
}

module attributes {stable_mosaic.version = 11 : i64} {
  func.func @_qkv_kernel(%arg0: i32, %arg1: i32, %arg2: memref<1x8x32xf32, #tpu.memory_space<vmem>>, %arg3: memref<1x32xf32, #tpu.memory_space<vmem>>, %arg4: memref<32x32xbf16, #tpu.memory_space<vmem>>, %arg5: memref<1x32xf32, #tpu.memory_space<vmem>>, %arg6: memref<32x64xbf16, #tpu.memory_space<vmem>>, %arg7: memref<1x64xf32, #tpu.memory_space<vmem>>, %arg8: memref<1x4x8x8xbf16, #tpu.memory_space<vmem>>, %arg9: memref<1x4x8x8xbf16, #tpu.memory_space<vmem>>, %arg10: memref<1x4x8x8xbf16, #tpu.memory_space<vmem>>) attributes {dimension_semantics = [#tpu.dimension_semantics<parallel>, #tpu.dimension_semantics<parallel>], iteration_bounds = array<i64: 2, 1>, scalar_prefetch = 0 : i64, scratch_operands = 0 : i64, tpu.core_type = #tpu.core_type<tc>, window_params = [{transform_indices = @transform_0, window_bounds = array<i64: 1, 8, 32>}, {pipeline_mode = #tpu.pipeline_mode<synchronous>, transform_indices = @transform_1, window_bounds = array<i64: 1, 32>}, {pipeline_mode = #tpu.pipeline_mode<synchronous>, transform_indices = @transform_2, window_bounds = array<i64: 32, 32>}, {pipeline_mode = #tpu.pipeline_mode<synchronous>, transform_indices = @transform_3, window_bounds = array<i64: 1, 32>}, {pipeline_mode = #tpu.pipeline_mode<synchronous>, transform_indices = @transform_4, window_bounds = array<i64: 32, 64>}, {pipeline_mode = #tpu.pipeline_mode<synchronous>, transform_indices = @transform_5, window_bounds = array<i64: 1, 64>}, {transform_indices = @transform_6, window_bounds = array<i64: 1, 4, 8, 8>}, {transform_indices = @transform_7, window_bounds = array<i64: 1, 4, 8, 8>}, {transform_indices = @transform_8, window_bounds = array<i64: 1, 4, 8, 8>}]} {
    %c0 = arith.constant 0 : index
    %c0_0 = arith.constant 0 : index
    %c0_1 = arith.constant 0 : index
    %0 = vector.load %arg2[%c0, %c0_0, %c0_1] : memref<1x8x32xf32, #tpu.memory_space<vmem>>, vector<1x8x32xf32>
    %1 = vector.shape_cast %0 : vector<1x8x32xf32> to vector<8x32xf32>
    %c0_2 = arith.constant 0 : index
    %c0_3 = arith.constant 0 : index
    %2 = vector.load %arg3[%c0_2, %c0_3] : memref<1x32xf32, #tpu.memory_space<vmem>>, vector<1x32xf32>
    %3 = vector.shape_cast %2 : vector<1x32xf32> to vector<32xf32>
    %4 = arith.mulf %1, %1 : vector<8x32xf32>
    %cst = arith.constant dense<0.000000e+00> : vector<8xf32>
    %5 = vector.multi_reduction <add>, %4, %cst [1] : vector<8x32xf32> to vector<8xf32>
    %6 = vector.shape_cast %5 : vector<8xf32> to vector<8x1xf32>
    %cst_4 = arith.constant 3.200000e+01 : f32
    %7 = vector.broadcast %cst_4 : f32 to vector<8x1xf32>
    %8 = arith.divf %6, %7 : vector<8x1xf32>
    %cst_5 = arith.constant 9.99999997E-7 : f32
    %9 = vector.broadcast %cst_5 : f32 to vector<8x1xf32>
    %10 = arith.addf %8, %9 : vector<8x1xf32>
    %11 = math.rsqrt %10 : vector<8x1xf32>
    %12 = vector.broadcast %11 : vector<8x1xf32> to vector<8x32xf32>
    %13 = arith.mulf %1, %12 : vector<8x32xf32>
    %14 = vector.shape_cast %3 : vector<32xf32> to vector<1x32xf32>
    %15 = vector.broadcast %14 : vector<1x32xf32> to vector<8x32xf32>
    %16 = arith.mulf %13, %15 : vector<8x32xf32>
    %17 = arith.truncf %16 : vector<8x32xf32> to vector<8x32xbf16>
    %c0_6 = arith.constant 0 : index
    %c0_7 = arith.constant 0 : index
    %18 = vector.load %arg4[%c0_6, %c0_7] : memref<32x32xbf16, #tpu.memory_space<vmem>>, vector<32x32xbf16>
    %cst_8 = arith.constant dense<0.000000e+00> : vector<8x32xf32>
    %19 = tpu.matmul %17, %18, %cst_8 {dimension_numbers = #tpu.dot_dimension_numbers<[1], [0], [0], [1], [0, 0, 1, 1], [], []>} : vector<8x32xbf16>, vector<32x32xbf16>, vector<8x32xf32> -> vector<8x32xf32>
    %c0_9 = arith.constant 0 : index
    %c0_10 = arith.constant 0 : index
    %20 = vector.load %arg5[%c0_9, %c0_10] : memref<1x32xf32, #tpu.memory_space<vmem>>, vector<1x32xf32>
    %21 = vector.shape_cast %20 : vector<1x32xf32> to vector<32xf32>
    %22 = vector.shape_cast %21 : vector<32xf32> to vector<1x32xf32>
    %23 = vector.broadcast %22 : vector<1x32xf32> to vector<8x32xf32>
    %24 = arith.addf %19, %23 : vector<8x32xf32>
    %c0_11 = arith.constant 0 : index
    %c0_12 = arith.constant 0 : index
    %25 = vector.load %arg6[%c0_11, %c0_12] : memref<32x64xbf16, #tpu.memory_space<vmem>>, vector<32x64xbf16>
    %cst_13 = arith.constant dense<0.000000e+00> : vector<8x64xf32>
    %26 = tpu.matmul %17, %25, %cst_13 {dimension_numbers = #tpu.dot_dimension_numbers<[1], [0], [0], [1], [0, 0, 1, 1], [], []>} : vector<8x32xbf16>, vector<32x64xbf16>, vector<8x64xf32> -> vector<8x64xf32>
    %c0_14 = arith.constant 0 : index
    %c0_15 = arith.constant 0 : index
    %27 = vector.load %arg7[%c0_14, %c0_15] : memref<1x64xf32, #tpu.memory_space<vmem>>, vector<1x64xf32>
    %28 = vector.shape_cast %27 : vector<1x64xf32> to vector<64xf32>
    %29 = vector.shape_cast %28 : vector<64xf32> to vector<1x64xf32>
    %30 = vector.broadcast %29 : vector<1x64xf32> to vector<8x64xf32>
    %31 = arith.addf %26, %30 : vector<8x64xf32>
    %cst_16 = arith.constant 0.353553385 : f32
    %32 = vector.broadcast %cst_16 : f32 to vector<8x32xf32>
    %33 = arith.mulf %24, %32 : vector<8x32xf32>
    %34 = vector.shape_cast %33 : vector<8x32xf32> to vector<8x4x8xf32>
    %35 = tpu.transpose %34, [1, 0, 2] : vector<8x4x8xf32> -> vector<4x8x8xf32>
    %36 = arith.truncf %35 : vector<4x8x8xf32> to vector<4x8x8xbf16>
    %c0_17 = arith.constant 0 : index
    %c0_18 = arith.constant 0 : index
    %c0_19 = arith.constant 0 : index
    %c0_20 = arith.constant 0 : index
    %37 = vector.load %arg8[%c0_17, %c0_18, %c0_19, %c0_20] : memref<1x4x8x8xbf16, #tpu.memory_space<vmem>>, vector<1x4x8x8xbf16>
    %38 = vector.shape_cast %37 : vector<1x4x8x8xbf16> to vector<4x8x8xbf16>
    %39 = vector.shape_cast %36 : vector<4x8x8xbf16> to vector<1x4x8x8xbf16>
    tpu.vector_store %arg8[%c0_17, %c0_18, %c0_19, %c0_20], %39 {strides = array<i32>} : memref<1x4x8x8xbf16, #tpu.memory_space<vmem>>, vector<1x4x8x8xbf16>,
    %40 = vector.extract_strided_slice %31 {offsets = [0, 0], sizes = [8, 32], strides = [1, 1]} : vector<8x64xf32> to vector<8x32xf32>
    %41 = vector.shape_cast %40 : vector<8x32xf32> to vector<8x4x8xf32>
    %42 = tpu.transpose %41, [1, 0, 2] : vector<8x4x8xf32> -> vector<4x8x8xf32>
    %43 = arith.truncf %42 : vector<4x8x8xf32> to vector<4x8x8xbf16>
    %c0_21 = arith.constant 0 : index
    %c0_22 = arith.constant 0 : index
    %c0_23 = arith.constant 0 : index
    %c0_24 = arith.constant 0 : index
    %44 = vector.load %arg9[%c0_21, %c0_22, %c0_23, %c0_24] : memref<1x4x8x8xbf16, #tpu.memory_space<vmem>>, vector<1x4x8x8xbf16>
    %45 = vector.shape_cast %44 : vector<1x4x8x8xbf16> to vector<4x8x8xbf16>
    %46 = vector.shape_cast %43 : vector<4x8x8xbf16> to vector<1x4x8x8xbf16>
    tpu.vector_store %arg9[%c0_21, %c0_22, %c0_23, %c0_24], %46 {strides = array<i32>} : memref<1x4x8x8xbf16, #tpu.memory_space<vmem>>, vector<1x4x8x8xbf16>,
    %47 = vector.extract_strided_slice %31 {offsets = [0, 32], sizes = [8, 32], strides = [1, 1]} : vector<8x64xf32> to vector<8x32xf32>
    %48 = vector.shape_cast %47 : vector<8x32xf32> to vector<8x4x8xf32>
    %49 = tpu.transpose %48, [1, 0, 2] : vector<8x4x8xf32> -> vector<4x8x8xf32>
    %50 = arith.truncf %49 : vector<4x8x8xf32> to vector<4x8x8xbf16>
    %c0_25 = arith.constant 0 : index
    %c0_26 = arith.constant 0 : index
    %c0_27 = arith.constant 0 : index
    %c0_28 = arith.constant 0 : index
    %51 = vector.load %arg10[%c0_25, %c0_26, %c0_27, %c0_28] : memref<1x4x8x8xbf16, #tpu.memory_space<vmem>>, vector<1x4x8x8xbf16>
    %52 = vector.shape_cast %51 : vector<1x4x8x8xbf16> to vector<4x8x8xbf16>
    %53 = vector.shape_cast %50 : vector<4x8x8xbf16> to vector<1x4x8x8xbf16>
    tpu.vector_store %arg10[%c0_25, %c0_26, %c0_27, %c0_28], %53 {strides = array<i32>} : memref<1x4x8x8xbf16, #tpu.memory_space<vmem>>, vector<1x4x8x8xbf16>,
    return
  }
  func.func @transform_0(%arg0: i32, %arg1: i32) -> (i32, i32, i32) {
    %c0_i32 = arith.constant 0 : i32
    %c0_i32_0 = arith.constant 0 : i32
    return %arg0, %arg1, %c0_i32 : i32, i32, i32
  }
  func.func @transform_1(%arg0: i32, %arg1: i32) -> (i32, i32) {
    %c0_i32 = arith.constant 0 : i32
    %c0_i32_0 = arith.constant 0 : i32
    %c0_i32_1 = arith.constant 0 : i32
    return %c0_i32, %c0_i32_0 : i32, i32
  }
  func.func @transform_2(%arg0: i32, %arg1: i32) -> (i32, i32) {
    %c0_i32 = arith.constant 0 : i32
    %c0_i32_0 = arith.constant 0 : i32
    %c0_i32_1 = arith.constant 0 : i32
    return %c0_i32, %c0_i32_0 : i32, i32
  }
  func.func @transform_3(%arg0: i32, %arg1: i32) -> (i32, i32) {
    %c0_i32 = arith.constant 0 : i32
    %c0_i32_0 = arith.constant 0 : i32
    %c0_i32_1 = arith.constant 0 : i32
    return %c0_i32, %c0_i32_0 : i32, i32
  }
  func.func @transform_4(%arg0: i32, %arg1: i32) -> (i32, i32) {
    %c0_i32 = arith.constant 0 : i32
    %c0_i32_0 = arith.constant 0 : i32
    %c0_i32_1 = arith.constant 0 : i32
    return %c0_i32, %c0_i32_0 : i32, i32
  }
  func.func @transform_5(%arg0: i32, %arg1: i32) -> (i32, i32) {
    %c0_i32 = arith.constant 0 : i32
    %c0_i32_0 = arith.constant 0 : i32
    %c0_i32_1 = arith.constant 0 : i32
    return %c0_i32, %c0_i32_0 : i32, i32
  }
  func.func @transform_6(%arg0: i32, %arg1: i32) -> (i32, i32, i32, i32) {
    %c0_i32 = arith.constant 0 : i32
    %c0_i32_0 = arith.constant 0 : i32
    %c0_i32_1 = arith.constant 0 : i32
    return %arg0, %c0_i32, %arg1, %c0_i32_0 : i32, i32, i32, i32
  }
  func.func @transform_7(%arg0: i32, %arg1: i32) -> (i32, i32, i32, i32) {
    %c0_i32 = arith.constant 0 : i32
    %c0_i32_0 = arith.constant 0 : i32
    %c0_i32_1 = arith.constant 0 : i32
    return %arg0, %c0_i32, %arg1, %c0_i32_0 : i32, i32, i32, i32
  }
  func.func @transform_8(%arg0: i32, %arg1: i32) -> (i32, i32, i32, i32) {
    %c0_i32 = arith.constant 0 : i32
    %c0_i32_0 = arith.constant 0 : i32
    %c0_i32_1 = arith.constant 0 : i32
    return %arg0, %c0_i32, %arg1, %c0_i32_0 : i32, i32, i32, i32
  }
}

</mosaic_0001>

<bundles_post_ra>
// kernel: tpu_custom_call.1
= control target key start
LH: loop header
LB: loop body
LE: loop exit
PB: predicated region body
PF: predicated region fallthrough
CT: control target
= control target key end

     0   :  { %6 = vsyncpa [#allocation3], 0  ;;  %s125_s0 = inlined_call_operand.hbm [shape: f32[8,128], index: 0, kind: input, shape index: {}]   ;;  %s126_s1 = inlined_call_operand.hbm [shape: f32[8,128], index: 1, kind: output, shape index: {}]  }
   0x1   :  { %7 = vsyncpa [#allocation4], 0  ;;  %s89_s6 = smov [#allocation2]   ;;  %s41_s10 = scalar_lea.hbm %s125_s0, 128 }
   0x2   :  { %s14_s7 = sshll.u32 %s89_s6, 4  ;;  %p42_p0 = scmp.ne.s32.totalorder %s125_s0, %s41_s10  ;;  %s15_s7 = int_to_ptr.vmem [resolvable:$true] %s14_s7 }
   0x3   :  { %p45_p1 = scmp.lt.u32.totalorder %s41_s10, %s125_s0 }
   0x5   :  { %p47_p2 = pnand %p45_p1, %p42_p0 }
   0x7   :  { %50 = shalt.err (!%p47_p2)
}
   0x8   :  { %s51_s15 = scalar_lea.vmem %s15_s7, 128  ;;  %p56_p4 = scmp.lt.s32.totalorder %s15_s7, %s15_s7 }
   0x9   :  { %p52_p3 = scmp.ne.s32.totalorder %s15_s7, %s51_s15  ;;  %p57_p5 = scmp.lt.s32.totalorder %s51_s15, %s51_s15 }
   0xb   :  { %p58_p6 = por %p57_p5, %p56_p4 }
   0xd   :  { %p59_p7 = pnand %p58_p6, %p52_p3 }
   0xf   :  { %62 = shalt.err (!%p59_p7)
}
  0x10   :  { %17 = dma.hbm_to_vmem [thread:$0]  %s125_s0, 128, %s15_s7, [#allocation3]  }
  0x11   :  { %85 = dma.done.wait [#allocation3], 128  }
  0x12   :  { %86 = vsyncadd [#allocation3], 4294967168  ;;  %s90_s18 = smov [#allocation5]   ;;  %v21_v0 = vld [vmem:[#allocation2] sm:$0xff] }
  0x13   :  { %s30_s19 = sshll.u32 %s90_s18, 4  ;;  %v22_v1 = vmul.f32 2.0, %v21_v0  ;;  %s31_s19 = int_to_ptr.vmem [resolvable:$true] %s30_s19 }
  0x14   :  { %s63_s20 = scalar_lea.vmem %s31_s19, 128  ;;  %p68_p9 = scmp.lt.s32.totalorder %s31_s19, %s31_s19 }
  0x15   :  { %23 = vst [vmem:[#allocation5] sm:$0xff] %v22_v1  ;;  %p64_p8 = scmp.ne.s32.totalorder %s31_s19, %s63_s20  ;;  %p69_p10 = scmp.lt.s32.totalorder %s63_s20, %s63_s20 }
  0x17   :  { %p70_p11 = por %p69_p10, %p68_p9 }
  0x19   :  { %p71_p12 = pnand %p70_p11, %p64_p8 }
  0x1b   :  { %74 = shalt.err (!%p71_p12)
}
  0x1c   :  { %s75_s23 = scalar_lea.hbm %s126_s1, 128 }
  0x1d   :  { %p76_p13 = scmp.ne.s32.totalorder %s126_s1, %s75_s23  ;;  %p79_p0 = scmp.lt.u32.totalorder %s75_s23, %s126_s1 }
  0x1f   :  { %p81_p1 = pnand %p79_p0, %p76_p13 }
  0x21   :  { %84 = shalt.err (!%p81_p1)
}
  0x22   :  { %33 = dma.vmem_to_hbm [thread:$0]  %s31_s19, 128, %s126_s1, [#allocation4]  }
  0x23   :  { %87 = dma.done.wait [#allocation4], 128  }
  0x24   :  { %88 = vsyncadd [#allocation4], 4294967168 }
  0x25   :  { %37 = vsyncpa [#allocation3], 1 }
  0x26   :  { %38 = vsyncpa [#allocation4], 1 }

// kernel: tpu_custom_call.1
= control target key start
LH: loop header
LB: loop body
LE: loop exit
PB: predicated region body
PF: predicated region fallthrough
CT: control target
= control target key end

     0   :  { %14 = vsyncpa [#allocation3], 0  ;;  %s2128_s0 = inlined_call_operand.hbm [shape: f32[2,8,32], index: 0, kind: input, shape index: {}]   ;;  %s2129_s1 = inlined_call_operand.vmem [shape: f32[1,32], index: 1, kind: input, shape index: {}]   ;;  %s2130_s2 = inlined_call_operand.hbm [shape: bf16[32,32], index: 2, kind: input, shape index: {}]   ;;  %s2131_s3 = inlined_call_operand.vmem [shape: f32[1,32], index: 3, kind: input, shape index: {}]   ;;  %s2132_s4 = inlined_call_operand.hbm [shape: bf16[32,64], index: 4, kind: input, shape index: {}]   ;;  %s2133_s5 = inlined_call_operand.vmem [shape: f32[1,64], index: 5, kind: input, shape index: {}]   ;;  %s2134_s6 = inlined_call_operand.hbm [shape: bf16[2,4,8,8], index: 6, kind: output, shape index: {0}]   ;;  %s2135_s7 = inlined_call_operand.hbm [shape: bf16[2,4,8,8], index: 7, kind: output, shape index: {1}]   ;;  %s2136_s8 = inlined_call_operand.hbm [shape: bf16[2,4,8,8], index: 8, kind: output, shape index: {2}]  }
   0x1   :  { %16 = vsyncpa [#allocation3 + $0x1], 0 }
   0x2   :  { %17 = vsyncpa [#allocation6], 0 }
   0x3   :  { %18 = vsyncpa [#allocation4], 0 }
   0x4   :  { %20 = vsyncpa [#allocation4 + $0x1], 0 }
   0x5   :  { %21 = vsyncpa [#allocation10], 0 }
   0x6   :  { %23 = vsyncpa [#allocation10 + $0x1], 0  ;;  %s1706_s27 = smov 0   ;;  %s1708_s28 = smov 0  }
   0x7   :  { %s1710_s29 = smov 0   ;;  %s1712_s30 = smov 0  }
   0x8   :  { %s1714_s9 = smov 0   ;;  %s1716_s10 = smov 0  }
   0x9 LB: > { %2145 = sst [smem:[#allocation16_spill]] %s1621_s27  ;;  %s1737_s11 = sadd.s32 4294967295, %s1641_s10   ;;  %s1641_s10 = sphi %s1716_s10, %s29_s10   ;;  %s1637_s9 = sphi %s1714_s9, %s2169_s9   ;;  %s1633_s30 = sphi %s1712_s30, %s2168_s30   ;;  %s1629_s29 = sphi %s1710_s29, %s2167_s29   ;;  %s1625_s28 = sphi %s1708_s28, %s2166_s28   ;;  %s1621_s27 = sphi %s1706_s27, %s2165_s27  }
   0xa   : > { %s2138_s12 = sadd.s32 4294967294, %s1641_s10   ;;  %p63_p0 = scmp.ne.s32.totalorder %s1625_s28, %s1621_s27 }
   0xb   : > { %p2137_p1 = scmp.eq.s32.totalorder %s1737_s11, 0  ;;  %p200_p3 = scmp.eq.s32.totalorder %s2138_s12, 1 }
   0xc   : > { %p1234_p5 = scmp.ge.s32.totalorder %s1641_s10, 1  ;;  %p263_p7 = scmp.lt.s32.totalorder %s1641_s10, 3 }
   0xd   : > { %p1748_p4 = por %p2137_p1, %p63_p0  ;;  %p1753_p6 = por %p200_p3, %p63_p0 }
   0xe   : > { %p1758_p8 = pnand %p1234_p5, %p263_p7  ;;  %s1643_s16 = smov [#allocation5]  }
   0xf   : > { %s2146_s13 = scalar_select %p1748_p4, 1, 0 }
  0x10   : > { %s2147_s14 = scalar_select %p1753_p6, 1, 0 }
  0x11   : > { %s278_s17 = sshll.u32 %s1643_s16, 4  ;;  %p1314_p9 = pneg %p1758_p8  ;;  %s1762_s17 = int_to_ptr.vmem [resolvable:$true] %s278_s17 }
  0x12   : > { %2148 = sst [smem:[#allocation17_spill]] %s2147_s14  ;;  %s1644_s19 = smov [#allocation7]  }
  0x13   : > { %p1769_p11 = pnand %p1314_p9, %p2137_p1  ;;  %s294_s20 = sshll.u32 %s1644_s19, 4  ;;  %s1773_s20 = int_to_ptr.vmem [resolvable:$true] %s294_s20 }
  0x14   : > { %s1409_s23 = scalar_lea.hbm %s2130_s2, 256 }
  0x15   : > { %p1410_p12 = scmp.ne.s32.totalorder %s2130_s2, %s1409_s23  ;;  %p1411_p13 = pneg %p1769_p11 }
  0x16   : > { %p1416_p5 = scmp.lt.u32.totalorder %s1409_s23, %s2130_s2 }
  0x17   : > { %p1412_p0 = pnand %p1411_p13, %p1410_p12 }
  0x19   : > { %p1413_p3 = pneg %p1412_p0 }
  0x1b   : > { %p1418_p7 = pnand %p1416_p5, %p1413_p3 }
  0x1d   : > { %1421 = shalt.err (!%p1418_p7)
}
  0x1e   : > { %s1422_s19 = scalar_lea.vmem %s1762_s17, 256  ;;  %p1430_p2 = scmp.lt.s32.totalorder %s1762_s17, %s1762_s17 }
  0x1f   : > { %p1423_p9 = scmp.ne.s32.totalorder %s1762_s17, %s1422_s19  ;;  %p1431_p12 = scmp.lt.s32.totalorder %s1422_s19, %s1422_s19 }
  0x21   : > { %p1425_p10 = pnand %p1423_p9, %p1411_p13  ;;  %p1432_p0 = por %p1431_p12, %p1430_p2 }
  0x23   : > { %p1426_p1 = pneg %p1425_p10 }
  0x25   : > { %p1433_p6 = pnand %p1432_p0, %p1426_p1 }
  0x27   : > { %1436 = shalt.err (!%p1433_p6)
}
  0x28   : > { %s1645_s21 = smov 64   ;;  %s1646_s22 = smov 4  }
  0x29   : > { %1317 = dma.hbm_to_vmem [thread:$0]  (!%p1769_p11), %s2130_s2, 256, %s1762_s17, [#allocation6], %s1645_s21, %s1645_s21, %s1646_s22  }
  0x2a   : > { %s1437_s16 = scalar_lea.hbm %s2132_s4, 256 }
  0x2b   : > { %p1438_p2 = scmp.ne.s32.totalorder %s2132_s4, %s1437_s16  ;;  %p1444_p10 = scmp.lt.u32.totalorder %s1437_s16, %s2132_s4 }
  0x2d   : > { %p1440_p1 = pnand %p1438_p2, %p1411_p13 }
  0x2f   : > { %p1441_p6 = pneg %p1440_p1 }
  0x31   : > { %p1446_p3 = pnand %p1444_p10, %p1441_p6 }
  0x33   : > { %1449 = shalt.err (!%p1446_p3)
}
  0x34   : > { %s1450_s17 = scalar_lea.vmem %s1773_s20, 256  ;;  %p1458_p12 = scmp.lt.s32.totalorder %s1773_s20, %s1773_s20 }
  0x35   : > { %p1451_p5 = scmp.ne.s32.totalorder %s1773_s20, %s1450_s17  ;;  %p1459_p0 = scmp.lt.s32.totalorder %s1450_s17, %s1450_s17 }
  0x37   : > { %p1453_p7 = pnand %p1451_p5, %p1411_p13  ;;  %p1460_p2 = por %p1459_p0, %p1458_p12 }
  0x39   : > { %p1454_p9 = pneg %p1453_p7 }
  0x3b   : > { %p1461_p1 = pnand %p1460_p2, %p1454_p9 }
  0x3d   : > { %1464 = shalt.err (!%p1461_p1)
}
  0x3e   : > { %1320 = dma.hbm_to_vmem [thread:$0]  (!%p1769_p11), %s2132_s4, 256, %s1773_s20, [#allocation6], %s1645_s21, %s1645_s21, %s1646_s22  }
  0x3f   : > { %s41_s14 = sadd.s32 1, %s1637_s9  ;;  %s50_s23 = sadd.s32 1, %s1629_s29 }
  0x40   : > { %p43_p13 = scmp.ge.s32.totalorder %s41_s14, 2  ;;  %p57_p6 = scmp.ne.s32.totalorder %s1629_s29, %s1625_s28 }
  0x41   : > { %p58_p10 = scmp.eq.s32.totalorder %s1641_s10, 0  ;;  %p1337_p3 = scmp.lt.s32.totalorder %s1641_s10, 2 }
  0x42   : > { %s2171_s14 = smov (%p43_p13, %s41_s14), 0  ;;  %p2151_p7 = scmp.eq.s32.totalorder %s1737_s11, 1 }
  0x43   : > { %p59_p5 = por %p58_p10, %p57_p6  ;;  %s45_s24 = ssub.s32 %s1637_s9, %s2171_s14 }
  0x44   : > { %p1837_p9 = por %p2151_p7, %p57_p6  ;;  %s311_s25 = sand.u32 1, %s1629_s29  }
  0x45   : > { %p48_p12 = scmp.eq.s32.totalorder %s45_s24, 0  ;;  %s1238_s20 = sshll.u32 %s311_s25, 3 }
  0x46   : > { %s2152_s18 = scalar_select %p1837_p9, 1, 0 }
  0x47   : > { %s1239_s21 = sshll.u32 %s1637_s9, 7  ;;  %s315_s17 = scalar_lea.vmem [#allocation2], %s1238_s20 }
  0x48   : > { %s1846_s22 = scalar_select %p48_p12, %s1629_s29, %s50_s23  }
  0x49   : > { %s1851_s19 = scalar_lea.hbm %s2128_s0, %s1239_s21  ;;  %s323_s27 = sshll.u32 %s315_s17, 4  ;;  %s1859_s27 = int_to_ptr.vmem [resolvable:$true] %s323_s27 }
  0x4a   : > { %p1855_p11 = pnand %p1337_p3, %p59_p5  ;;  %s312_s23 = scalar_lea.sflag [#allocation3], %s311_s25 }
  0x4b   : > { %s1465_s24 = scalar_lea.hbm %s1851_s19, 128  ;;  %s1470_s26 = scalar_lea.hbm %s2128_s0, 256 }
  0x4c   : > { %p1466_p0 = scmp.ne.s32.totalorder %s1851_s19, %s1465_s24  ;;  %p1467_p2 = pneg %p1855_p11 }
  0x4d   : > { %p1471_p6 = scmp.lt.u32.totalorder %s1851_s19, %s2128_s0  ;;  %p1472_p10 = scmp.lt.u32.totalorder %s1470_s26, %s1465_s24 }
  0x4e   : > { %p1468_p1 = pnand %p1467_p2, %p1466_p0  ;;  %p1474_p5 = scmp.lt.u32.totalorder %s1465_s24, %s1851_s19 }
  0x4f   : > { %p1473_p3 = por %p1472_p10, %p1471_p6 }
  0x50   : > { %p1469_p13 = pneg %p1468_p1 }
  0x51   : > { %p1475_p7 = por %p1474_p5, %p1473_p3 }
  0x53   : > { %p1476_p12 = pnand %p1475_p7, %p1469_p13 }
  0x55   : > { %1479 = shalt.err (!%p1476_p12)
}
  0x56   : > { %s1480_s25 = scalar_lea.vmem %s1859_s27, 128  ;;  %s1647_s20 = smov [#allocation2]  }
  0x57   : > { %p1481_p0 = scmp.ne.s32.totalorder %s1859_s27, %s1480_s25  ;;  %s1485_s21 = sshll.u32 %s1647_s20, 4  ;;  %s1486_s21 = int_to_ptr.vmem [resolvable:$false] %s1485_s21 }
  0x58   : > { %s1487_s16 = scalar_lea.vmem %s1486_s21, 256  ;;  %p1488_p4 = scmp.lt.s32.totalorder %s1859_s27, %s1486_s21 }
  0x59   : > { %p1483_p1 = pnand %p1481_p0, %p1467_p2  ;;  %p1489_p6 = scmp.lt.s32.totalorder %s1487_s16, %s1480_s25 }
  0x5b   : > { %p1484_p9 = pneg %p1483_p1  ;;  %p1490_p10 = por %p1489_p6, %p1488_p4 }
  0x5d   : > { %p1491_p3 = pnand %p1490_p10, %p1484_p9 }
  0x5f   : > { %1494 = shalt.err (!%p1491_p3)
}
  0x60   : > { %1324 = dma.hbm_to_vmem [thread:$0]  (!%p1855_p11), %s1851_s19, 128, %s1859_s27, %s312_s23  }
  0x61   : > { %332 = sbr.rel (%p1758_p8) target bundleno = 758 (0x2f6), region = 44  ;;  %s1889_s24 = sand.u32 (!%p1758_p8), 1, %s1625_s28  }
  0x62   : > { %s1241_s26 = sshll.u32 (!%p1758_p8), %s1889_s24, 3  ;;  %s335_s17 = scalar_lea.sflag (!%p1758_p8), [#allocation3], %s1889_s24 }
  0x63   : > { %s338_s25 = scalar_lea.vmem (!%p1758_p8), [#allocation2], %s1241_s26  ;;  %p2154_p4 = scmp.ne.s32.totalorder (!%p1758_p8), %s2146_s13, 0 }
  0x68   : > { %1604 = dma.done.wait (%p2154_p4), %s335_s17, 128  }
  0x69   : > { %1606 = vsyncadd (%p2154_p4), %s335_s17, 4294967168  ;;  %p2155_p9 = scmp.eq.s32.totalorder %s1737_s11, 0 }
  0x6b   : > { %1608 = dma.done.wait (%p2155_p9), [#allocation6], 512   ;;  %p2156_p11 = pmov %p2155_p9 }
  0x6c   : > { %v390_v0 = vld [vmem:[%s338_s25] sm:$0xff]  ;;  %vm393_vm0 = vcmask 261120   ;;  %v1403_v3 = vld [vmem:[#allocation5] sm:$0xff]   ;;  %v1648_v5 = vmov 0.0   ;;  %v1405_v6 = vld [vmem:[#allocation5 + $0x8] sm:$0xff]   ;;  %vm1649_vm1 = vmmov 0   ;;  %v555_v31 = vlaneseq }
  0x6d   : > { %1610 = vsyncadd (%p2156_p11), [#allocation6], 4294966784  ;;  %v392_v1 = vmul.f32 %v390_v0, %v390_v0  ;;  %v1404_v4 = vld [vmem:[#allocation7] sm:$0xff]   ;;  %1282 = vmatprep.subr.bf16.mxu0 %v1648_v5  ;;  %1290 = vmatprep.subr.bf16.mxu1 %v1648_v5  ;;  %v1406_v7 = vld [vmem:[#allocation7 + $0x8] sm:$0xff]   ;;  %s1650_s12 = smov 112   ;;  %s1651_s23 = smov 120  }
  0x6e   : > { %1283 = vmatpush3.bf16.msra.mxu0 %v1403_v3  ;;  %1291 = vmatpush3.bf16.msra.mxu1 %v1404_v4  ;;  %v1247_v12 = vld [vmem:[%s2129_s1] ss:$0 sm:$0xff]  ;;  %s1652_s16 = smov 104   ;;  %s1653_s26 = smov 96   ;;  %v1654_v29 = vmov 1983009808  }
  0x6f   : > { %v394_v2 = vsel %vm393_vm0, %v392_v1, 0.0  ;;  %1284 = vmatprep.subr.bf16.mxu0 %v1648_v5  ;;  %1292 = vmatprep.subr.bf16.mxu1 %v1648_v5  ;;  %v1252_v16 = vld [vmem:[%s2133_s5] ss:$0 sm:$0xff]  ;;  %v553_v30 = vunpack.c.l.s4 %v1654_v29  ;;  %v1655_v32 = vmov 1934713408   ;;  %v556_v35 = vshrl.u32 %v555_v31, 7 }
  0x70   : > { %395 = vadd.xlane.f32.xlu0 %v394_v2  ;;  %1286 = vmatprep.mubr.msk.bf16.mxu0 %vm1649_vm1, %v1648_v5  ;;  %v1248_v26 = vld [vmem:[%s2131_s3] ss:$0 sm:$0xff]  ;;  %v585_v33 = vunpack.c.l.s4 %v1655_v32  ;;  %s1937_s17 = sshll.u32 %s1889_s24, 4  ;;  %s1010_s25 = sand.u32 1, %s1737_s11   ;;  %vm690_vm2 = vcmask 60416  }
  0x71   : > { %1294 = vmatprep.mubr.msk.bf16.mxu1 %vm1649_vm1, %v1648_v5  ;;  %v554_v34 = vunpack.c.0.s8 %v553_v30  ;;  %s1947_s13 = sshll.u32 %s1633_s30, 8  ;;  %s381_s15 = scalar_lea.vmem [#allocation9], %s1937_s17 }
  0x72   : > { %1285 = vmatpush3.bf16.msra.mxu0 %v1405_v6  ;;  %1293 = vmatpush3.bf16.msra.mxu1 %v1406_v7  ;;  %v586_v38 = vunpack.c.0.s8 %v585_v33  ;;  %s1047_s19 = sshll.u32 %s381_s15, 4  ;;  %s1954_s30 = scalar_lea.hbm %s2135_s7, %s1947_s13  ;;  %s1956_s19 = int_to_ptr.vmem [resolvable:$true] %s1047_s19 }
  0x73   : > { %v1918_v39 = vsub.s32 %v554_v34, %v556_v35  ;;  %s1495_s20 = scalar_lea.vmem %s1956_s19, 256  ;;  %p2157_p2 = scmp.ne.s32.totalorder %s2152_s18, 0 }
  0x74   : > { %v1920_v45 = vsub.s32 %v586_v38, %v556_v35  ;;  %p1496_p8 = scmp.ne.s32.totalorder %s1956_s19, %s1495_s20  ;;  %s1656_s21 = smov [#allocation9]  }
  0x76   : > { %p1497_p13 = pnand %p1496_p8, %p2157_p2 }
  0x78   : > { %p1498_p5 = pneg %p1497_p13 }
  0xfd   : > { %v396_v8 = vpop.xlane.xlu0 %395 }
  0xfe   : > { %v398_v9 = vmul.f32 0.03125, %v396_v8 }
 0x100   : > { %v399_v10 = vadd.f32 1e-06, %v398_v9 }
 0x102   : > { %1407 = vrsqrt.f32 %v399_v10 }
 0x10c   : > { %v1408_v11 = vpop.eup %1407 }
 0x10d   : > { %v401_v13 = vmul.f32 %v1408_v11, %v390_v0 }
 0x10f   : > { %v408_v14 = vmul.f32 %v1247_v12, %v401_v13 }
 0x111   : > { %v409_v15 = vpack.c.bf16 %v408_v14, %v408_v14 }
 0x113   : > { %1287 = vmatmul.mubr.msk.bf16.vlgmr.msra.gmra.mrb[0].mxu0 %vm393_vm0, %v409_v15  ;;  %1295 = vmatmul.mubr.msk.bf16.vlgmr.msra.gmra.mrb[0].mxu1 %vm393_vm0, %v409_v15 }
 0x1e6   : > { %v470_v17 = vpop.f32.mrb[0].mxu0  ;;  %v533_v18 = vpop.f32.mrb[0].mxu1 }
 0x1e7   : > { %v534_v19 = vadd.f32 %v1252_v16, %v533_v18  ;;  %v1288_v20 = vpop.f32.mrb[1].mxu0  ;;  %v1296_v21 = vpop.f32.mrb[1].mxu1  ;;  %v471_v27 = vadd.f32 %v1248_v26, %v470_v17 }
 0x1e8   : > { %v473_v22 = vpop.f32.mrb[2].mxu0  ;;  %v536_v23 = vpop.f32.mrb[2].mxu1 }
 0x1e9   : > { %699 = vrot.lane.b32.xlu1 %v534_v19, %s1650_s12  ;;  %696 = vrot.lane.b32.xlu0 %v534_v19, %s1651_s23  ;;  %v1289_v24 = vpop.f32.mrb[3].mxu0  ;;  %v1297_v25 = vpop.f32.mrb[3].mxu1  ;;  %v1913_v28 = vmul.f32 0.35355338, %v471_v27 }
 0x1ed   : > { %702 = vrot.lane.b32.xlu1 %v534_v19, %s1652_s16 }
 0x1f1   : > { %849 = vrot.lane.b32.xlu1 %v534_v19, %s1653_s26 }
 0x1f5   : > { %541 = vrot.lane.b32.xlu1 %v1913_v28, %s1651_s23  ;;  %s1968_s23 = scalar_lea.sflag [#allocation10], %s1010_s25 }
 0x1f9   : > { %544 = vrot.lane.b32.xlu1 %v1913_v28, %s1650_s12 }
 0x1fd   : > { %547 = vrot.lane.b32.xlu1 %v1913_v28, %s1652_s16  ;;  %s1499_s16 = sshll.u32 %s1656_s21, 4  ;;  %s1500_s16 = int_to_ptr.vmem [resolvable:$false] %s1499_s16 }
 0x1fe   : > { %p1502_p7 = scmp.lt.s32.totalorder %s1956_s19, %s1500_s16 }
 0x25b   : > { %v700_v36 = vpop.permute.xlu1 %699  ;;  %v697_v37 = vpop.permute.xlu0 %696 }
 0x25c   : > { %853 = vrot.lane.b32.xlu0 %v700_v36, %s1653_s26  ;;  %851 = vrot.lane.b32.xlu1 %v697_v37, %s1653_s26  ;;  %v705_v40 = vcombine.low %v534_v19, %v700_v36  ;;  %v706_v41 = vcombine.high %v534_v19, %v700_v36 }
 0x25e   : > { %v713_v46 = vrot.slane %v705_v40, %v1918_v39  ;;  %v720_v47 = vrot.slane %v706_v41, %v1918_v39 }
 0x25f   : > { %v703_v42 = vpop.permute.xlu1 %702 }
 0x260   : > { %v721_v43 = vcombine.low %v697_v37, %v703_v42  ;;  %v722_v44 = vcombine.high %v697_v37, %v703_v42  ;;  %855 = vrot.lane.b32.xlu1 %v703_v42, %s1653_s26  ;;  %s1501_s26 = scalar_lea.vmem %s1500_s16, 512 }
 0x261   : > { %p1503_p12 = scmp.lt.s32.totalorder %s1501_s26, %s1495_s20 }
 0x262   : > { %v729_v48 = vrot.slane %v721_v43, %v1918_v39  ;;  %v736_v49 = vrot.slane %v722_v44, %v1918_v39 }
 0x263   : > { %v1926_v50 = vpop.permute.xlu1 %849  ;;  %p1504_p0 = por %p1503_p12, %p1502_p7 }
 0x264   : > { %v737_v51 = vcombine.low %v713_v46, %v729_v48  ;;  %v738_v52 = vcombine.high %v713_v46, %v729_v48  ;;  %v753_v53 = vcombine.low %v720_v47, %v736_v49  ;;  %v754_v54 = vcombine.high %v720_v47, %v736_v49 }
 0x265   : > { %p1505_p1 = pnand %p1504_p0, %p1498_p5 }
 0x266   : > { %v745_v55 = vrot.slane %v737_v51, %v1920_v45  ;;  %v752_v56 = vrot.slane %v738_v52, %v1920_v45  ;;  %v761_v57 = vrot.slane %v753_v53, %v1920_v45  ;;  %v768_v58 = vrot.slane %v754_v54, %v1920_v45 }
 0x267   : > { %v542_v59 = vpop.permute.xlu1 %541 }
 0x268   : > { %v773_v60 = vcombine.low %v745_v55, %v752_v56  ;;  %v1258_v61 = vcombine.high %v745_v55, %v752_v56  ;;  %v789_v62 = vcombine.low %v761_v57, %v768_v58  ;;  %v1259_v63 = vcombine.high %v761_v57, %v768_v58 }
 0x26a   : > { %v780_v0 = vrot.slane %v773_v60, %v1918_v39  ;;  %v788_v1 = vrot.slane %v1258_v61, %v1918_v39  ;;  %v796_v2 = vrot.slane %v789_v62, %v1918_v39  ;;  %v804_v3 = vrot.slane %v1259_v63, %v1918_v39 }
 0x26b   : > { %v545_v4 = vpop.permute.xlu1 %544 }
 0x26c   : > { %v805_v5 = vcombine.low %v780_v0, %v788_v1  ;;  %v806_v6 = vcombine.high %v780_v0, %v788_v1  ;;  %v821_v7 = vcombine.low %v796_v2, %v804_v3  ;;  %v822_v8 = vcombine.high %v796_v2, %v804_v3 }
 0x26d   : > { %v550_v13 = vcombine.low %v1913_v28, %v545_v4  ;;  %v551_v14 = vcombine.high %v1913_v28, %v545_v4 }
 0x26e   : > { %v813_v9 = vrot.slane %v805_v5, %v1920_v45  ;;  %v820_v10 = vrot.slane %v806_v6, %v1920_v45  ;;  %v829_v11 = vrot.slane %v821_v7, %v1920_v45  ;;  %v836_v12 = vrot.slane %v822_v8, %v1920_v45 }
 0x26f   : > { %v548_v15 = vpop.permute.xlu1 %547  ;;  %v558_v26 = vrot.slane %v550_v13, %v1918_v39  ;;  %v565_v27 = vrot.slane %v551_v14, %v1918_v39 }
 0x270   : > { %v837_v16 = vcombine.low %v813_v9, %v829_v11  ;;  %v838_v17 = vcombine.high %v813_v9, %v829_v11  ;;  %v839_v18 = vcombine.low %v820_v10, %v836_v12  ;;  %v840_v19 = vcombine.high %v820_v10, %v836_v12 }
 0x271   : > { %v566_v20 = vcombine.low %v542_v59, %v548_v15  ;;  %v567_v21 = vcombine.high %v542_v59, %v548_v15 }
 0x272   : > { %v841_v22 = vpack.c.bf16 %v837_v16, %v837_v16  ;;  %v842_v23 = vpack.c.bf16 %v838_v17, %v838_v17  ;;  %v843_v24 = vpack.c.bf16 %v839_v18, %v839_v18  ;;  %v844_v25 = vpack.c.bf16 %v840_v19, %v840_v19 }
 0x273   : > { %v574_v28 = vrot.slane %v566_v20, %v1918_v39  ;;  %v581_v29 = vrot.slane %v567_v21, %v1918_v39 }
 0x274   : > { %845 = vst.msk [vmem:[%s381_s15] sm:$0xf] %vm690_vm2, %v841_v22  ;;  %846 = vst.msk [vmem:[%s381_s15 + $0x4] sm:$0xf] %vm690_vm2, %v842_v23 }
 0x275   : > { %847 = vst.msk [vmem:[%s381_s15 + $0x8] sm:$0xf] %vm690_vm2, %v843_v24  ;;  %848 = vst.msk [vmem:[%s381_s15 + $0xc] sm:$0xf] %vm690_vm2, %v844_v25  ;;  %v582_v30 = vcombine.low %v558_v26, %v574_v28  ;;  %v583_v31 = vcombine.high %v558_v26, %v574_v28  ;;  %v598_v32 = vcombine.low %v565_v27, %v581_v29 }
 0x276   : > { %v599_v33 = vcombine.high %v565_v27, %v581_v29 }
 0x277   : > { %1508 = shalt.err (!%p1505_p1)
}
 0x278   : > { %s1509_s11 = scalar_lea.hbm %s1954_s30, 256  ;;  %s1513_s27 = scalar_lea.hbm %s2135_s7, 512 }
 0x279   : > { %p1510_p6 = scmp.ne.s32.totalorder %s1954_s30, %s1509_s11  ;;  %p1514_p4 = scmp.lt.u32.totalorder %s1954_s30, %s2135_s7 }
 0x27a   : > { %p1515_p9 = scmp.lt.u32.totalorder %s1513_s27, %s1509_s11  ;;  %p1517_p8 = scmp.lt.u32.totalorder %s1509_s11, %s1954_s30 }
 0x27b   : > { %p1511_p10 = pnand %p1510_p6, %p2157_p2 }
 0x27c   : > { %p1516_p11 = por %p1515_p9, %p1514_p4 }
 0x27d   : > { %p1512_p3 = pneg %p1511_p10 }
 0x27e   : > { %p1518_p13 = por %p1517_p8, %p1516_p11 }
 0x280   : > { %p1519_p5 = pnand %p1518_p13, %p1512_p3 }
 0x282   : > { %1522 = shalt.err (!%p1519_p5)
}
 0x283   : > { %s2143_s20 = smov 64   ;;  %s1658_s16 = smov 4   ;;  %v590_v34 = vrot.slane %v582_v30, %v1920_v45  ;;  %v597_v35 = vrot.slane %v583_v31, %v1920_v45  ;;  %v606_v36 = vrot.slane %v598_v32, %v1920_v45  ;;  %v613_v37 = vrot.slane %v599_v33, %v1920_v45 }
 0x284   : > { %1309 = dma.vmem_to_hbm [thread:$0]  (%p2157_p2), %s1956_s19, 256, %s1954_s30, %s1968_s23, %s2143_s20, %s2143_s20, %s1658_s16  }
 0x285   : > { %v618_v38 = vcombine.low %v590_v34, %v597_v35  ;;  %v1256_v40 = vcombine.high %v590_v34, %v597_v35  ;;  %v634_v41 = vcombine.low %v606_v36, %v613_v37  ;;  %v1257_v42 = vcombine.high %v606_v36, %v613_v37  ;;  %s374_s19 = scalar_lea.vmem [#allocation8], %s1937_s17  ;;  %s2012_s25 = scalar_lea.hbm %s2134_s6, %s1947_s13 }
 0x286   : > { %s1030_s30 = sshll.u32 %s374_s19, 4  ;;  %s1659_s12 = smov [#allocation8]   ;;  %s2014_s30 = int_to_ptr.vmem [resolvable:$true] %s1030_s30 }
 0x287   : > { %v625_v43 = vrot.slane %v618_v38, %v1918_v39  ;;  %v633_v44 = vrot.slane %v1256_v40, %v1918_v39  ;;  %v641_v46 = vrot.slane %v634_v41, %v1918_v39  ;;  %v649_v47 = vrot.slane %v1257_v42, %v1918_v39  ;;  %s1523_s27 = scalar_lea.vmem %s2014_s30, 256  ;;  %s1527_s21 = sshll.u32 %s1659_s12, 4  ;;  %s1528_s21 = int_to_ptr.vmem [resolvable:$false] %s1527_s21 }
 0x288   : > { %p1524_p7 = scmp.ne.s32.totalorder %s2014_s30, %s1523_s27  ;;  %s1529_s26 = scalar_lea.vmem %s1528_s21, 512 }
 0x289   : > { %v650_v48 = vcombine.low %v625_v43, %v633_v44  ;;  %v651_v49 = vcombine.high %v625_v43, %v633_v44  ;;  %v666_v51 = vcombine.low %v641_v46, %v649_v47  ;;  %v667_v52 = vcombine.high %v641_v46, %v649_v47  ;;  %p1530_p1 = scmp.lt.s32.totalorder %s2014_s30, %s1528_s21  ;;  %p1531_p6 = scmp.lt.s32.totalorder %s1529_s26, %s1523_s27 }
 0x28a   : > { %p1525_p12 = pnand %p1524_p7, %p2157_p2 }
 0x28b   : > { %v658_v53 = vrot.slane %v650_v48, %v1920_v45  ;;  %v665_v54 = vrot.slane %v651_v49, %v1920_v45  ;;  %v674_v55 = vrot.slane %v666_v51, %v1920_v45  ;;  %v681_v56 = vrot.slane %v667_v52, %v1920_v45  ;;  %p1532_p10 = por %p1531_p6, %p1530_p1 }
 0x28c   : > { %p1526_p0 = pneg %p1525_p12 }
 0x28d   : > { %v682_v57 = vcombine.low %v658_v53, %v674_v55  ;;  %v683_v58 = vcombine.high %v658_v53, %v674_v55  ;;  %v684_v59 = vcombine.low %v665_v54, %v681_v56  ;;  %v685_v60 = vcombine.high %v665_v54, %v681_v56 }
 0x28e   : > { %p1533_p3 = pnand %p1532_p10, %p1526_p0 }
 0x28f   : > { %v686_v61 = vpack.c.bf16 %v682_v57, %v682_v57  ;;  %v687_v62 = vpack.c.bf16 %v683_v58, %v683_v58  ;;  %v688_v63 = vpack.c.bf16 %v684_v59, %v684_v59  ;;  %v689_v0 = vpack.c.bf16 %v685_v60, %v685_v60 }
 0x291   : > { %691 = vst.msk [vmem:[%s374_s19] sm:$0xf] %vm690_vm2, %v686_v61  ;;  %692 = vst.msk [vmem:[%s374_s19 + $0x4] sm:$0xf] %vm690_vm2, %v687_v62 }
 0x292   : > { %693 = vst.msk [vmem:[%s374_s19 + $0x8] sm:$0xf] %vm690_vm2, %v688_v63  ;;  %694 = vst.msk [vmem:[%s374_s19 + $0xc] sm:$0xf] %vm690_vm2, %v689_v0 }
 0x293   : > { %1536 = shalt.err (!%p1533_p3)
}
 0x294   : > { %s1537_s19 = scalar_lea.hbm %s2012_s25, 256  ;;  %s1541_s12 = scalar_lea.hbm %s2134_s6, 512 }
 0x295   : > { %p1538_p4 = scmp.ne.s32.totalorder %s2012_s25, %s1537_s19  ;;  %p1542_p8 = scmp.lt.u32.totalorder %s2012_s25, %s2134_s6 }
 0x296   : > { %p1543_p13 = scmp.lt.u32.totalorder %s1541_s12, %s1537_s19  ;;  %p1545_p7 = scmp.lt.u32.totalorder %s1537_s19, %s2012_s25 }
 0x297   : > { %p1539_p9 = pnand %p1538_p4, %p2157_p2 }
 0x298   : > { %p1544_p5 = por %p1543_p13, %p1542_p8 }
 0x299   : > { %p1540_p11 = pneg %p1539_p9 }
 0x29a   : > { %p1546_p12 = por %p1545_p7, %p1544_p5 }
 0x29c   : > { %p1547_p0 = pnand %p1546_p12, %p1540_p11 }
 0x29e   : > { %1550 = shalt.err (!%p1547_p0)
}
 0x29f   : > { %s2158_s27 = smov 64   ;;  %s2159_s26 = scalar_lea.sflag [#allocation4], %s1889_s24 }
 0x2a0   : > { %1308 = dma.vmem_to_hbm [thread:$0]  (%p2157_p2), %s2014_s30, 256, %s2012_s25, %s2159_s26, %s2158_s27, %s2158_s27, %s1658_s16  }
 0x2a1   : > { %s388_s24 = scalar_lea.vmem [#allocation11], %s1937_s17  ;;  %s2070_s15 = scalar_lea.hbm %s2136_s8, %s1947_s13 }
 0x2a2   : > { %s1064_s20 = sshll.u32 %s388_s24, 4  ;;  %s1660_s13 = smov [#allocation11]   ;;  %s2072_s20 = int_to_ptr.vmem [resolvable:$true] %s1064_s20 }
 0x2a3   : > { %s1551_s17 = scalar_lea.vmem %s2072_s20, 256  ;;  %s1555_s19 = sshll.u32 %s1660_s13, 4  ;;  %s1556_s19 = int_to_ptr.vmem [resolvable:$false] %s1555_s19 }
 0x2a4   : > { %p1552_p1 = scmp.ne.s32.totalorder %s2072_s20, %s1551_s17  ;;  %s1557_s11 = scalar_lea.vmem %s1556_s19, 512 }
 0x2a5   : > { %p1558_p3 = scmp.lt.s32.totalorder %s2072_s20, %s1556_s19  ;;  %p1559_p4 = scmp.lt.s32.totalorder %s1557_s11, %s1551_s17 }
 0x2a6   : > { %p1553_p6 = pnand %p1552_p1, %p2157_p2 }
 0x2a7   : > { %p1560_p9 = por %p1559_p4, %p1558_p3 }
 0x2a8   : > { %p1554_p10 = pneg %p1553_p6 }
 0x2aa   : > { %p1561_p11 = pnand %p1560_p9, %p1554_p10 }
 0x2ce   : > { %v854_v1 = vpop.permute.xlu0 %853  ;;  %v852_v2 = vpop.permute.xlu1 %851 }
 0x2cf   : > { %v861_v3 = vcombine.low %v1926_v50, %v854_v1  ;;  %v862_v4 = vcombine.high %v1926_v50, %v854_v1 }
 0x2d1   : > { %v869_v8 = vrot.slane %v861_v3, %v1918_v39  ;;  %v876_v9 = vrot.slane %v862_v4, %v1918_v39 }
 0x2d2   : > { %v856_v5 = vpop.permute.xlu1 %855 }
 0x2d3   : > { %v877_v6 = vcombine.low %v852_v2, %v856_v5  ;;  %v878_v7 = vcombine.high %v852_v2, %v856_v5 }
 0x2d5   : > { %v885_v10 = vrot.slane %v877_v6, %v1918_v39  ;;  %v892_v11 = vrot.slane %v878_v7, %v1918_v39 }
 0x2d7   : > { %v893_v12 = vcombine.low %v869_v8, %v885_v10  ;;  %v894_v13 = vcombine.high %v869_v8, %v885_v10  ;;  %v909_v14 = vcombine.low %v876_v9, %v892_v11  ;;  %v910_v15 = vcombine.high %v876_v9, %v892_v11 }
 0x2d9   : > { %v901_v16 = vrot.slane %v893_v12, %v1920_v45  ;;  %v908_v17 = vrot.slane %v894_v13, %v1920_v45  ;;  %v917_v50 = vrot.slane %v909_v14, %v1920_v45  ;;  %v924_v18 = vrot.slane %v910_v15, %v1920_v45 }
 0x2db   : > { %v929_v19 = vcombine.low %v901_v16, %v908_v17  ;;  %v1260_v20 = vcombine.high %v901_v16, %v908_v17  ;;  %v945_v21 = vcombine.low %v917_v50, %v924_v18  ;;  %v1261_v22 = vcombine.high %v917_v50, %v924_v18 }
 0x2dd   : > { %v936_v23 = vrot.slane %v929_v19, %v1918_v39  ;;  %v944_v24 = vrot.slane %v1260_v20, %v1918_v39  ;;  %v952_v25 = vrot.slane %v945_v21, %v1918_v39  ;;  %v960_v26 = vrot.slane %v1261_v22, %v1918_v39 }
 0x2df   : > { %v961_v27 = vcombine.low %v936_v23, %v944_v24  ;;  %v962_v28 = vcombine.high %v936_v23, %v944_v24  ;;  %v977_v29 = vcombine.low %v952_v25, %v960_v26  ;;  %v978_v30 = vcombine.high %v952_v25, %v960_v26 }
 0x2e1   : > { %v969_v31 = vrot.slane %v961_v27, %v1920_v45  ;;  %v976_v32 = vrot.slane %v962_v28, %v1920_v45  ;;  %v985_v33 = vrot.slane %v977_v29, %v1920_v45  ;;  %v992_v34 = vrot.slane %v978_v30, %v1920_v45 }
 0x2e3   : > { %v993_v35 = vcombine.low %v969_v31, %v985_v33  ;;  %v994_v36 = vcombine.high %v969_v31, %v985_v33  ;;  %v995_v37 = vcombine.low %v976_v32, %v992_v34  ;;  %v996_v39 = vcombine.high %v976_v32, %v992_v34 }
 0x2e5   : > { %v997_v38 = vpack.c.bf16 %v993_v35, %v993_v35  ;;  %v998_v40 = vpack.c.bf16 %v994_v36, %v994_v36  ;;  %v999_v41 = vpack.c.bf16 %v995_v37, %v995_v37  ;;  %v1000_v42 = vpack.c.bf16 %v996_v39, %v996_v39 }
 0x2e7   : > { %1001 = vst.msk [vmem:[%s388_s24] sm:$0xf] %vm690_vm2, %v997_v38  ;;  %1002 = vst.msk [vmem:[%s388_s24 + $0x4] sm:$0xf] %vm690_vm2, %v998_v40 }
 0x2e8   : > { %1003 = vst.msk [vmem:[%s388_s24 + $0x8] sm:$0xf] %vm690_vm2, %v999_v41  ;;  %1004 = vst.msk [vmem:[%s388_s24 + $0xc] sm:$0xf] %vm690_vm2, %v1000_v42 }
 0x2e9   : > { %1564 = shalt.err (!%p1561_p11)
}
 0x2ea   : > { %s1565_s12 = scalar_lea.hbm %s2070_s15, 256  ;;  %s1569_s24 = scalar_lea.hbm %s2136_s8, 512 }
 0x2eb   : > { %p1566_p8 = scmp.ne.s32.totalorder %s2070_s15, %s1565_s12  ;;  %p1570_p7 = scmp.lt.u32.totalorder %s2070_s15, %s2136_s8 }
 0x2ec   : > { %p1571_p12 = scmp.lt.u32.totalorder %s1569_s24, %s1565_s12  ;;  %p1573_p1 = scmp.lt.u32.totalorder %s1565_s12, %s2070_s15 }
 0x2ed   : > { %p1567_p13 = pnand %p1566_p8, %p2157_p2 }
 0x2ee   : > { %p1572_p0 = por %p1571_p12, %p1570_p7 }
 0x2ef   : > { %p1568_p5 = pneg %p1567_p13 }
 0x2f0   : > { %p1574_p6 = por %p1573_p1, %p1572_p0 }
 0x2f2   : > { %p1575_p10 = pnand %p1574_p6, %p1568_p5 }
 0x2f4   : > { %1578 = shalt.err (!%p1575_p10)
}
 0x2f5   : > { %1310 = dma.vmem_to_hbm [thread:$0]  (%p2157_p2), %s2072_s20, 256, %s2070_s15, %s1968_s23, %s2158_s27, %s2158_s27, %s1658_s16  }
 0x2f6 PF: > { %s2160_s17 = sld [smem:[#allocation16_spill]]  ;;  %s2161_s13 = sld [smem:[#allocation17_spill]] }
 0x2f7   : > { %p2163_p4 = scmp.ge.s32.totalorder %s1641_s10, 2 }
 0x2fc   : > { %s1079_s19 = sand.u32 1, %s2160_s17   ;;  %p2162_p3 = scmp.ne.s32.totalorder %s2161_s13, 0 }
 0x2fd   : > { %s1080_s11 = scalar_lea.sflag [#allocation4], %s1079_s19 }
 0x2fe   : > { %p1326_p9 = pnand %p2163_p4, %p2162_p3 }
 0x300   : > { %1612 = dma.done.wait (!%p1326_p9), %s1080_s11, 256  }
 0x301   : > { %1614 = vsyncadd (!%p1326_p9), %s1080_s11, 4294967040  ;;  %s2164_s18 = sadd.s32 4294967294, %s1641_s10  }
 0x302   : > { %s1088_s12 = sand.u32 1, %s2164_s18  }
 0x303   : > { %s1089_s21 = scalar_lea.sflag [#allocation10], %s1088_s12 }
 0x304   : > { %1616 = dma.done.wait (!%p1326_p9), %s1089_s21, 512  }
 0x305   : > { %1618 = vsyncadd (!%p1326_p9), %s1089_s21, 4294966784  ;;  %s29_s10 = sadd.s32 1, %s1641_s10   ;;  %s2165_s27 = smov %s1625_s28 }
 0x306   : > { %p26_p2 = scmp.ge.s32.totalorder %s29_s10, 4   ;;  %s2166_s28 = smov %s1629_s29 }
 0x307   : > { %s2167_s29 = smov %s1846_s22  ;;  %s2168_s30 = smov %s1637_s9 }
 0x308   : > { %s2169_s9 = smov %s2171_s14  ;;  %28 = sbr.rel (!%p26_p2) target bundleno = 9 (0x9), region = 129 }
 0x30f   :  { %1103 = vsyncpa [#allocation3], 1 }
 0x310   :  { %1105 = vsyncpa [#allocation3 + $0x1], 1 }
 0x311   :  { %1106 = vsyncpa [#allocation6], 1 }
 0x312   :  { %1107 = vsyncpa [#allocation4], 1 }
 0x313   :  { %1109 = vsyncpa [#allocation4 + $0x1], 1 }
 0x314   :  { %1110 = vsyncpa [#allocation10], 1 }
 0x315   :  { %1112 = vsyncpa [#allocation10 + $0x1], 1 }

</bundles_post_ra>
